<compile_context>
chip_gen: v7x
topology: tpu7x:2x2x1
jax: 0.10.0
libtpu: 0.0.40
codegen_flags: <defaults>
</compile_context>

<pallas_src>
import jax
import jax.numpy as jnp
from jax.experimental import pallas as pl
from jax.experimental.pallas import tpu as pltpu


def _round_up(x, m):
    return (x + m - 1) // m * m


def _node_apply_kernel(h_ref, w_ref, o_ref):
    # MXU matmul with f32 accumulate, ReLU on the VPU, cast on store.
    acc = jnp.dot(h_ref[...], w_ref[...], preferred_element_type=jnp.float32)
    o_ref[...] = jnp.maximum(acc, 0.0).astype(o_ref.dtype)


def node_apply_module(h, w_t, *, tile_m=1024):
    """GCN node-apply: ReLU(h @ w_t), no bias.

    h:   [N, in_feats]            (rows = nodes, features on lanes)
    w_t: [in_feats, out_feats]    (transpose of torch nn.Linear.weight)
    returns [N, out_feats] in h.dtype
    """
    N, in_feats = h.shape
    in_feats_w, out_feats = w_t.shape
    assert in_feats == in_feats_w

    # --- lane/sublane aligned padded shapes -------------------------------
    in_p = _round_up(in_feats, 128)    # lane-dense K
    out_p = _round_up(out_feats, 128)  # lane-dense output (unmasked vst)
    tile_m = _round_up(max(8, tile_m), 8)
    # Don't over-pad tiny graphs: clamp the tile to (padded) N.
    tile_m = min(tile_m, _round_up(N, 8))
    n_p = _round_up(N, tile_m)

    # Zero-padding is semantically neutral: padded K rows/cols contribute 0 to the
    # matmul, padded output rows/cols are sliced off below (ReLU(0) == 0).
    if (n_p, in_p) != (N, in_feats):
        h_pad = jnp.pad(h, ((0, n_p - N), (0, in_p - in_feats)))
    else:
        h_pad = h
    if (in_p, out_p) != (in_feats, out_feats):
        w_pad = jnp.pad(w_t, ((0, in_p - in_feats), (0, out_p - out_feats)))
    else:
        w_pad = w_t

    grid = (n_p // tile_m,)

    # VMEM budget (double-buffered h + out blocks, resident weight) stays in the
    # low-MiB range for these feature widths, well under v5e/v6e/v7x scoped limits,
    # so no explicit vmem_limit_bytes is needed. Re-derive if feature dims grow large.
    cost = pl.CostEstimate(
        flops=2 * n_p * in_p * out_p,
        transcendentals=0,
        bytes_accessed=4 * (n_p * in_p + in_p * out_p + n_p * out_p),
    )

    out_pad = pl.pallas_call(
        _node_apply_kernel,
        out_shape=jax.ShapeDtypeStruct((n_p, out_p), h.dtype),
        grid_spec=pltpu.PrefetchScalarGridSpec(
            num_scalar_prefetch=0,
            grid=grid,
            in_specs=[
                # tile over nodes; feature (K) dim kept whole in one block
                pl.BlockSpec((tile_m, in_p), lambda i: (i, 0)),
                # weight: same full block every grid step -> stays resident in VMEM
                pl.BlockSpec((in_p, out_p), lambda i: (0, 0)),
            ],
            out_specs=pl.BlockSpec((tile_m, out_p), lambda i: (i, 0)),
        ),
        compiler_params=pltpu.CompilerParams(
            dimension_semantics=("parallel",),
        ),
        cost_estimate=cost,
    )(h_pad, w_pad)

    # Slice away padding.
    if (n_p, out_p) != (N, out_feats):
        return out_pad[:N, :out_feats]
    return out_pad


def reference(h, w_t):
    return jnp.maximum(h @ w_t, 0.0)


if __name__ == "__main__":
    key = jax.random.PRNGKey(0)
    k_h, k_w, k_h2, k_w2 = jax.random.split(key, 4)

    # --- test 1: original toy shape -------------------------------------
    N, in_feats, out_feats = 16, 32, 32
    h = jax.random.normal(k_h, (N, in_feats), dtype=jnp.float32)
    bound = 1.0 / jnp.sqrt(jnp.float32(in_feats))
    w = jax.random.uniform(k_w, (out_feats, in_feats), dtype=jnp.float32,
                           minval=-bound, maxval=bound)   # torch layout [out, in]
    w_t = w.T                                             # kernel layout [in, out]

    out = jax.block_until_ready(node_apply_module(h, w_t))
    ref = reference(h, w_t)
    assert out.shape == (N, out_feats)
    assert jnp.allclose(out, ref, atol=1e-5, rtol=1e-5)

    # --- test 2: non-aligned N / feature dims (exercises cdiv + padding) --
    N2, in2, out2 = 300, 96, 48
    h2 = jax.random.normal(k_h2, (N2, in2), dtype=jnp.float32)
    bound2 = 1.0 / jnp.sqrt(jnp.float32(in2))
    w2 = jax.random.uniform(k_w2, (out2, in2), dtype=jnp.float32,
                            minval=-bound2, maxval=bound2)
    w2_t = w2.T

    out2_k = jax.block_until_ready(node_apply_module(h2, w2_t, tile_m=1024))
    ref2 = reference(h2, w2_t)
    assert out2_k.shape == (N2, out2)
    assert jnp.allclose(out2_k, ref2, atol=1e-5, rtol=1e-5)

    # TODO(synk): optional bf16 cast of h / w_t at the call boundary (keeping f32
    # accumulate) would halve HBM traffic on v6e/v7x if the model tolerates it.

    print("KERNEL_OK")
</pallas_src>

<mosaic_0001>
module attributes {stable_mosaic.version = 11 : i64} {
  func.func @_node_apply_kernel(%arg0: i32, %arg1: memref<16x128xf32, #tpu.memory_space<vmem>>, %arg2: memref<128x128xf32, #tpu.memory_space<vmem>>, %arg3: memref<16x128xf32, #tpu.memory_space<vmem>>) attributes {dimension_semantics = [#tpu.dimension_semantics<parallel>], iteration_bounds = array<i64: 1>, scalar_prefetch = 0 : i64, scratch_operands = 0 : i64, tpu.core_type = #tpu.core_type<tc>, window_params = [{transform_indices = @transform_0, window_bounds = array<i64: 16, 128>}, {pipeline_mode = #tpu.pipeline_mode<synchronous>, transform_indices = @transform_1, window_bounds = array<i64: 128, 128>}, {transform_indices = @transform_2, window_bounds = array<i64: 16, 128>}]} {
    %c0 = arith.constant 0 : index
    %c0_0 = arith.constant 0 : index
    %0 = vector.load %arg1[%c0, %c0_0] : memref<16x128xf32, #tpu.memory_space<vmem>>, vector<16x128xf32>
    %c0_1 = arith.constant 0 : index
    %c0_2 = arith.constant 0 : index
    %1 = vector.load %arg2[%c0_1, %c0_2] : memref<128x128xf32, #tpu.memory_space<vmem>>, vector<128x128xf32>
    %cst = arith.constant dense<0.000000e+00> : vector<16x128xf32>
    %2 = tpu.matmul %0, %1, %cst {dimension_numbers = #tpu.dot_dimension_numbers<[1], [0], [0], [1], [0, 0, 1, 1], [], []>} : vector<16x128xf32>, vector<128x128xf32>, vector<16x128xf32> -> vector<16x128xf32>
    %cst_3 = arith.constant 0.000000e+00 : f32
    %3 = vector.broadcast %cst_3 : f32 to vector<16x128xf32>
    %4 = arith.maximumf %2, %3 : vector<16x128xf32>
    %c0_4 = arith.constant 0 : index
    %c0_5 = arith.constant 0 : index
    %5 = vector.load %arg3[%c0_4, %c0_5] : memref<16x128xf32, #tpu.memory_space<vmem>>, vector<16x128xf32>
    tpu.vector_store %arg3[%c0_4, %c0_5], %4 {strides = array<i32>} : memref<16x128xf32, #tpu.memory_space<vmem>>, vector<16x128xf32>,
    return
  }
  func.func @transform_0(%arg0: i32) -> (i32, i32) {
    %c0_i32 = arith.constant 0 : i32
    %c0_i32_0 = arith.constant 0 : i32
    return %arg0, %c0_i32 : i32, i32
  }
  func.func @transform_1(%arg0: i32) -> (i32, i32) {
    %c0_i32 = arith.constant 0 : i32
    %c0_i32_0 = arith.constant 0 : i32
    %c0_i32_1 = arith.constant 0 : i32
    return %c0_i32, %c0_i32_0 : i32, i32
  }
  func.func @transform_2(%arg0: i32) -> (i32, i32) {
    %c0_i32 = arith.constant 0 : i32
    %c0_i32_0 = arith.constant 0 : i32
    return %arg0, %c0_i32 : i32, i32
  }
}

</mosaic_0001>

<bundles_post_ra>
// kernel: tpu_custom_call.1
= control target key start
LH: loop header
LB: loop body
LE: loop exit
PB: predicated region body
PF: predicated region fallthrough
CT: control target
= control target key end

     0   :  { %7 = vsyncpa [#allocation3], 0  ;;  %s382_s0 = inlined_call_operand.hbm [shape: f32[16,128], index: 0, kind: input, shape index: {}]   ;;  %s383_s1 = inlined_call_operand.hbm [shape: f32[128,128], index: 1, kind: input, shape index: {}]   ;;  %s384_s2 = inlined_call_operand.hbm [shape: f32[16,128], index: 2, kind: output, shape index: {}]  }
   0x1   :  { %8 = vsyncpa [#allocation6], 0 }
   0x2   :  { %9 = vsyncpa [#allocation4], 0  ;;  %s317_s9 = smov [#allocation2]   ;;  %s245_s13 = scalar_lea.hbm %s382_s0, 256 }
   0x3   :  { %s15_s10 = sshll.u32 %s317_s9, 4  ;;  %p246_p0 = scmp.ne.s32.totalorder %s382_s0, %s245_s13  ;;  %s16_s10 = int_to_ptr.vmem [resolvable:$true] %s15_s10 }
   0x4   :  { %p249_p1 = scmp.lt.u32.totalorder %s245_s13, %s382_s0 }
   0x6   :  { %p251_p2 = pnand %p249_p1, %p246_p0 }
   0x8   :  { %254 = shalt.err (!%p251_p2)
}
   0x9   :  { %s255_s18 = scalar_lea.vmem %s16_s10, 256  ;;  %p260_p4 = scmp.lt.s32.totalorder %s16_s10, %s16_s10 }
   0xa   :  { %p256_p3 = scmp.ne.s32.totalorder %s16_s10, %s255_s18  ;;  %p261_p5 = scmp.lt.s32.totalorder %s255_s18, %s255_s18 }
   0xc   :  { %p262_p6 = por %p261_p5, %p260_p4 }
   0xe   :  { %p263_p7 = pnand %p262_p6, %p256_p3 }
  0x10   :  { %266 = shalt.err (!%p263_p7)
}
  0x11   :  { %s318_s19 = smov 128   ;;  %s319_s20 = smov 8  }
  0x12   :  { %21 = dma.hbm_to_vmem [thread:$0]  %s382_s0, 256, %s16_s10, [#allocation3], %s318_s19, %s318_s19, %s319_s20  }
  0x13   :  { %s320_s23 = smov [#allocation5]   ;;  %s267_s27 = scalar_lea.hbm %s383_s1, 2048 }
  0x14   :  { %s27_s24 = sshll.u32 %s320_s23, 4  ;;  %p268_p8 = scmp.ne.s32.totalorder %s383_s1, %s267_s27  ;;  %s28_s24 = int_to_ptr.vmem [resolvable:$true] %s27_s24 }
  0x15   :  { %p271_p9 = scmp.lt.u32.totalorder %s267_s27, %s383_s1 }
  0x17   :  { %p273_p10 = pnand %p271_p9, %p268_p8 }
  0x19   :  { %276 = shalt.err (!%p273_p10)
}
  0x1a   :  { %s277_s4 = scalar_lea.vmem %s28_s24, 2048  ;;  %p282_p12 = scmp.lt.s32.totalorder %s28_s24, %s28_s24 }
  0x1b   :  { %p278_p11 = scmp.ne.s32.totalorder %s28_s24, %s277_s4  ;;  %p283_p13 = scmp.lt.s32.totalorder %s277_s4, %s277_s4 }
  0x1d   :  { %p284_p0 = por %p283_p13, %p282_p12 }
  0x1f   :  { %p285_p1 = pnand %p284_p0, %p278_p11 }
  0x21   :  { %288 = shalt.err (!%p285_p1)
}
  0x22   :  { %33 = dma.hbm_to_vmem [thread:$0]  %s383_s1, 2048, %s28_s24, [#allocation6], %s318_s19, %s318_s19, %s319_s20  }
  0x23   :  { %311 = dma.done.wait [#allocation3], 256  }
  0x24   :  { %312 = vsyncadd [#allocation3], 4294967040 }
  0x25   :  { %313 = dma.done.wait [#allocation6], 2048  }
  0x26   :  { %314 = vsyncadd [#allocation6], 4294965248  ;;  %v42_v0 = vld [vmem:[#allocation5] sm:$0xff]  ;;  %v43_v1 = vld [vmem:[#allocation5 + $0x8] sm:$0xff]  ;;  %s321_s1 = smov [#allocation7]  }
  0x27   :  { %v44_v2 = vld [vmem:[#allocation5 + $0x10] sm:$0xff]  ;;  %v208_v3 = vpack.c.bf16 %v43_v1, %v42_v0  ;;  %v45_v4 = vld [vmem:[#allocation5 + $0x18] sm:$0xff]  ;;  %v46_v6 = vld [vmem:[#allocation5 + $0x20] sm:$0xff]  ;;  %s142_s6 = sshll.u32 %s321_s1, 4  ;;  %s143_s6 = int_to_ptr.vmem [resolvable:$true] %s142_s6 }
  0x28   :  { %v212_v5 = vpack.c.bf16 %v45_v4, %v44_v2  ;;  %v47_v7 = vld [vmem:[#allocation5 + $0x28] sm:$0xff]  ;;  %v40_v9 = vld [vmem:[#allocation2] sm:$0xff]  ;;  %v49_v11 = vld [vmem:[#allocation5 + $0x38] sm:$0xff]  ;;  %s289_s7 = scalar_lea.vmem %s143_s6, 256  ;;  %p294_p3 = scmp.lt.s32.totalorder %s143_s6, %s143_s6 }
  0x29   :  { %209 = vmatprep.subr.bf16.mxu0 %v208_v3  ;;  %v216_v8 = vpack.c.bf16 %v47_v7, %v46_v6  ;;  %v48_v10 = vld [vmem:[#allocation5 + $0x30] sm:$0xff]  ;;  %205 = vmatprep.mubr.f32.mxu0 %v40_v9  ;;  %v50_v13 = vld [vmem:[#allocation5 + $0x40] sm:$0xff]  ;;  %v51_v14 = vld [vmem:[#allocation5 + $0x48] sm:$0xff]  ;;  %p290_p2 = scmp.ne.s32.totalorder %s143_s6, %s289_s7  ;;  %p295_p4 = scmp.lt.s32.totalorder %s289_s7, %s289_s7 }
  0x2a   :  { %211 = vmatpush3.bf16.msra.mxu0 %v208_v3  ;;  %v220_v12 = vpack.c.bf16 %v49_v11, %v48_v10  ;;  %v224_v15 = vpack.c.bf16 %v51_v14, %v50_v13  ;;  %v52_v16 = vld [vmem:[#allocation5 + $0x50] sm:$0xff]  ;;  %v53_v17 = vld [vmem:[#allocation5 + $0x58] sm:$0xff]  ;;  %v54_v19 = vld [vmem:[#allocation5 + $0x60] sm:$0xff] }
  0x2b   :  { %213 = vmatprep.subr.bf16.mxu0 %v212_v5  ;;  %v228_v18 = vpack.c.bf16 %v53_v17, %v52_v16  ;;  %v55_v20 = vld [vmem:[#allocation5 + $0x68] sm:$0xff]  ;;  %v56_v22 = vld [vmem:[#allocation5 + $0x70] sm:$0xff]  ;;  %v57_v23 = vld [vmem:[#allocation5 + $0x78] sm:$0xff]  ;;  %p296_p5 = por %p295_p4, %p294_p3 }
  0x2c   :  { %v232_v21 = vpack.c.bf16 %v55_v20, %v54_v19  ;;  %v236_v24 = vpack.c.bf16 %v57_v23, %v56_v22  ;;  %v41_v25 = vld [vmem:[#allocation2 + $0x8] sm:$0xff] }
  0x2d   :  { %p297_p6 = pnand %p296_p5, %p290_p2 }
  0x2e   :  { %215 = vmatpush3.bf16.msra.mxu0 %v212_v5 }
  0x2f   :  { %217 = vmatprep.subr.bf16.mxu0 %v216_v8 }
  0x32   :  { %219 = vmatpush3.bf16.msra.mxu0 %v216_v8 }
  0x33   :  { %221 = vmatprep.subr.bf16.mxu0 %v220_v12 }
  0x36   :  { %223 = vmatpush3.bf16.msra.mxu0 %v220_v12 }
  0x37   :  { %225 = vmatprep.subr.bf16.mxu0 %v224_v15 }
  0x3a   :  { %227 = vmatpush3.bf16.msra.mxu0 %v224_v15 }
  0x3b   :  { %229 = vmatprep.subr.bf16.mxu0 %v228_v18 }
  0x3e   :  { %231 = vmatpush3.bf16.msra.mxu0 %v228_v18 }
  0x3f   :  { %233 = vmatprep.subr.bf16.mxu0 %v232_v21 }
  0x42   :  { %235 = vmatpush3.bf16.msra.mxu0 %v232_v21 }
  0x43   :  { %237 = vmatprep.subr.bf16.mxu0 %v236_v24 }
  0x46   :  { %239 = vmatpush3.bf16.msra.mxu0 %v236_v24 }
  0x49   :  { %206 = vmatmul.mubr.f32.vlgmr.msra.gmra.mrb[0].mxu0 %v41_v25 }
 0x11c   :  { %v207_v26 = vpop.f32.mrb[0].mxu0 }
 0x11d   :  { %v134_v27 = vmax.f32 %v207_v26, 0.0  ;;  %v124_v28 = vpop.f32.mrb[1].mxu0 }
 0x11e   :  { %v133_v29 = vmax.f32 %v124_v28, 0.0 }
 0x11f   :  { %136 = vst [vmem:[#allocation7 + $0x8] sm:$0xff] %v134_v27 }
 0x120   :  { %135 = vst [vmem:[#allocation7] sm:$0xff] %v133_v29 }
 0x121   :  { %300 = shalt.err (!%p297_p6)
}
 0x122   :  { %s301_s10 = scalar_lea.hbm %s384_s2, 256 }
 0x123   :  { %p302_p7 = scmp.ne.s32.totalorder %s384_s2, %s301_s10  ;;  %p305_p8 = scmp.lt.u32.totalorder %s301_s10, %s384_s2 }
 0x125   :  { %p307_p9 = pnand %p305_p8, %p302_p7 }
 0x127   :  { %310 = shalt.err (!%p307_p9)
}
 0x128   :  { %148 = dma.vmem_to_hbm [thread:$0]  %s143_s6, 256, %s384_s2, [#allocation4], %s318_s19, %s318_s19, %s319_s20  }
 0x129   :  { %315 = dma.done.wait [#allocation4], 256  }
 0x12a   :  { %316 = vsyncadd [#allocation4], 4294967040 }
 0x12b   :  { %152 = vsyncpa [#allocation3], 1 }
 0x12c   :  { %153 = vsyncpa [#allocation6], 1 }
 0x12d   :  { %154 = vsyncpa [#allocation4], 1 }

</bundles_post_ra>
